<compile_context>
chip_gen: v7x
topology: tpu7x:2x2x1
jax: 0.10.0
libtpu: 0.0.40
codegen_flags: <defaults>
</compile_context>

<pallas_src>
import functools

import jax
import jax.numpy as jnp
from jax.experimental import pallas as pl
from jax.experimental.pallas import tpu as pltpu

_EPS = 1e-8
_LANES = 128
_DEFAULT_BLOCK_ROWS = 512   # 512*128*4B = 256 KiB per input block; x2 inputs x2 buffers ~ 1 MiB
_NCORES = 2                 # leading "parallel" axis (v7x megacore); harmless on 1-TC chips


def _match_loss_partials_kernel(pivot_ref, d_ref, t_ref, sv_ref, sv2_ref, se2_ref):
    """Accumulate per-core 128-wide partial sums of v, v^2 and (d - t)^2."""
    step = pl.program_id(1)          # reduction axis ("arbitrary")

    @pl.when(step == 0)
    def _init():
        sv_ref[...] = jnp.zeros_like(sv_ref)
        sv2_ref[...] = jnp.zeros_like(sv2_ref)
        se2_ref[...] = jnp.zeros_like(se2_ref)

    pivot = pivot_ref[0]                       # f32 scalar from SMEM
    d = d_ref[...].astype(jnp.float32)         # (block_rows, 128); bf16 inputs upcast in-vreg
    t = t_ref[...].astype(jnp.float32)

    # One log per distinct input value.  Padded lanes (d == t == 0) give u == 0.0
    # and err == 0.0 exactly (see zero-pad invariant at the top of this file).
    u = jnp.log(d + _EPS) - jnp.log(t + _EPS)
    v = u - pivot                              # pivot shift: cancellation-resistant variance
    err = d - t

    # Sublane-axis partial sums only (VPU adds across vregs).  The cross-lane
    # (XLU) collapse of the 128-wide accumulators is deferred to the wrapper.
    sv_ref[...] += jnp.sum(v, axis=0, keepdims=True)
    sv2_ref[...] += jnp.sum(v * v, axis=0, keepdims=True)
    se2_ref[...] += jnp.sum(err * err, axis=0, keepdims=True)


@functools.partial(jax.jit, static_argnames=("block_rows",))
def match_loss(data: jax.Array, target: jax.Array, *,
               block_rows: int = _DEFAULT_BLOCK_ROWS) -> jax.Array:
    """Pallas TPU implementation of MatchLoss.forward for 1-D score vectors."""
    assert data.shape == target.shape
    assert data.ndim == 1
    n = int(data.shape[0])
    assert n >= 1

    # ---- blocked layout (static; derived from shapes only) -------------------
    rows = pl.cdiv(n, _LANES)
    if rows <= block_rows:
        ncores, br, steps = 1, rows, 1          # single block == full array dims
    else:
        assert block_rows % 8 == 0, "block_rows must be a multiple of 8"
        ncores, br = _NCORES, block_rows
        steps = pl.cdiv(rows, ncores * br)
    padded_rows = ncores * steps * br
    padded_n = padded_rows * _LANES
    pad = padded_n - n                           # number of zero-padded lanes (static)

    in_dtype = jnp.promote_types(data.dtype, target.dtype)
    if in_dtype not in (jnp.dtype(jnp.float32), jnp.dtype(jnp.bfloat16)):
        in_dtype = jnp.dtype(jnp.float32)
    if in_dtype == jnp.dtype(jnp.bfloat16) and br != padded_rows and br % 16 != 0:
        in_dtype = jnp.dtype(jnp.float32)        # respect bf16 (16,128) sublane tiling

    def _prep(x):
        x = x.reshape(-1)
        if x.dtype != in_dtype:
            x = x.astype(in_dtype)
        if pad:
            # Zero pad (see invariant note above).  Aligned inputs skip this copy;
            # the reshape below is metadata-only.
            x = jnp.pad(x, (0, pad))
        return x.reshape(padded_rows, _LANES)

    d2 = _prep(data)
    t2 = _prep(target)

    # Pivot for the shifted accumulation (any element works; u[0] is a good proxy
    # for mean(u) in the near-constant case that causes f32 cancellation).
    pivot = (jnp.log(data[0].astype(jnp.float32) + _EPS)
             - jnp.log(target[0].astype(jnp.float32) + _EPS))
    pivot_smem = pivot.reshape(1)

    row_block = lambda c, i: (c * steps + i, 0)
    acc_spec = pl.BlockSpec((None, 1, _LANES), lambda c, i: (c, 0, 0))
    acc_shape = jax.ShapeDtypeStruct((ncores, 1, _LANES), jnp.float32)

    sv_p, sv2_p, se2_p = pl.pallas_call(
        _match_loss_partials_kernel,
        grid=(ncores, steps),
        in_specs=[
            pl.BlockSpec(memory_space=pltpu.MemorySpace.SMEM),   # pivot scalar
            pl.BlockSpec((br, _LANES), row_block),
            pl.BlockSpec((br, _LANES), row_block),
        ],
        out_specs=(acc_spec, acc_spec, acc_spec),
        out_shape=(acc_shape, acc_shape, acc_shape),
        compiler_params=pltpu.CompilerParams(
            dimension_semantics=("parallel", "arbitrary")),
    )(pivot_smem, d2, t2)

    # ---- tiny epilogue: collapse 3 * ncores * 128 floats and combine ---------
    # The `pad` zero-padded lanes contributed exactly (-pivot, pivot^2, 0) each;
    # remove them with the static count.
    sum_v = jnp.sum(sv_p) + pad * pivot
    sum_v2 = jnp.sum(sv2_p) - pad * (pivot * pivot)
    sum_e2 = jnp.sum(se2_p)

    inv_n = 1.0 / n
    mean_v = sum_v * inv_n
    pair = 2.0 * (sum_v2 * inv_n - mean_v * mean_v)  # == mean_{i,j}((u_j - u_i)^2)
    pair = jnp.maximum(pair, 0.0)                    # guard f32 round-off
    return pair + sum_e2 * inv_n


def _reference_match_loss(data, target):
    """Pure-JAX reference mirroring the PyTorch module (materialized N x N)."""
    data = data.astype(jnp.float32)
    target = target.astype(jnp.float32)
    ld = jnp.log(data + _EPS)
    lt = jnp.log(target + _EPS)
    mat_d = ld[None, :] - ld[:, None]
    mat_t = lt[None, :] - lt[:, None]
    return jnp.mean((mat_d - mat_t) ** 2) + jnp.mean((data - target) ** 2)


if __name__ == "__main__":
    key = jax.random.PRNGKey(0)

    # Small case: batch of 8 regression scores (typical MatchLoss usage).
    k1, k2 = jax.random.split(key)
    d8 = jax.random.uniform(k1, (8,), jnp.float32, minval=0.05, maxval=1.0)
    t8 = jax.random.uniform(k2, (8,), jnp.float32, minval=0.05, maxval=1.0)
    out8 = match_loss(d8, t8)
    jax.block_until_ready(out8)
    ref8 = _reference_match_loss(d8, t8)
    assert jnp.allclose(out8, ref8, rtol=1e-5, atol=1e-5), (out8, ref8)

    # Unaligned multi-row case (exercises the zero-pad correction).
    k3, k4 = jax.random.split(k1)
    d300 = jax.random.uniform(k3, (300,), jnp.float32, minval=0.05, maxval=1.0)
    t300 = jax.random.uniform(k4, (300,), jnp.float32, minval=0.05, maxval=1.0)
    out300 = match_loss(d300, t300)
    jax.block_until_ready(out300)
    ref300 = _reference_match_loss(d300, t300)
    assert jnp.allclose(out300, ref300, rtol=1e-4, atol=1e-5), (out300, ref300)

    # Multi-block / two-core path: tiny block_rows so the grid has 2 cores x 2 steps.
    k5, k6 = jax.random.split(k2)
    n_big = 2200
    dl = jax.random.uniform(k5, (n_big,), jnp.float32, minval=0.05, maxval=1.0)
    tl = jax.random.uniform(k6, (n_big,), jnp.float32, minval=0.05, maxval=1.0)
    outl = match_loss(dl, tl, block_rows=8)
    jax.block_until_ready(outl)
    refl = _reference_match_loss(dl, tl)
    assert jnp.allclose(outl, refl, rtol=1e-4, atol=1e-4), (outl, refl)

    print("KERNEL_OK")
</pallas_src>

<mosaic_0001>
module attributes {stable_mosaic.version = 11 : i64} {
  func.func @_match_loss_partials_kernel(%arg0: i32, %arg1: i32, %arg2: memref<1xf32, #tpu.memory_space<smem>>, %arg3: memref<1x128xf32, #tpu.memory_space<vmem>>, %arg4: memref<1x128xf32, #tpu.memory_space<vmem>>, %arg5: memref<1x1x128xf32, #tpu.memory_space<vmem>>, %arg6: memref<1x1x128xf32, #tpu.memory_space<vmem>>, %arg7: memref<1x1x128xf32, #tpu.memory_space<vmem>>) attributes {dimension_semantics = [#tpu.dimension_semantics<parallel>, #tpu.dimension_semantics<arbitrary>], iteration_bounds = array<i64: 1, 1>, scalar_prefetch = 0 : i64, scratch_operands = 0 : i64, tpu.core_type = #tpu.core_type<tc>, window_params = [{transform_indices = @transform_0, window_bounds = array<i64: 1>}, {transform_indices = @transform_1, window_bounds = array<i64: 1, 128>}, {transform_indices = @transform_2, window_bounds = array<i64: 1, 128>}, {transform_indices = @transform_3, window_bounds = array<i64: 1, 1, 128>}, {transform_indices = @transform_4, window_bounds = array<i64: 1, 1, 128>}, {transform_indices = @transform_5, window_bounds = array<i64: 1, 1, 128>}]} {
    %c0_i32 = arith.constant 0 : i32
    %0 = arith.cmpi eq, %arg1, %c0_i32 : i32
    %1 = arith.extui %0 : i1 to i32
    %c0_i32_0 = arith.constant 0 : i32
    %2 = arith.cmpi ne, %1, %c0_i32_0 : i32
    scf.if %2 {
      %cst_27 = arith.constant 0.000000e+00 : f32
      %42 = vector.broadcast %cst_27 : f32 to vector<1x128xf32>
      %c0_28 = arith.constant 0 : index
      %c0_29 = arith.constant 0 : index
      %c0_30 = arith.constant 0 : index
      %43 = vector.load %arg5[%c0_28, %c0_29, %c0_30] : memref<1x1x128xf32, #tpu.memory_space<vmem>>, vector<1x1x128xf32>
      %44 = vector.shape_cast %43 : vector<1x1x128xf32> to vector<1x128xf32>
      %45 = vector.shape_cast %42 : vector<1x128xf32> to vector<1x1x128xf32>
      tpu.vector_store %arg5[%c0_28, %c0_29, %c0_30], %45 {strides = array<i32>} : memref<1x1x128xf32, #tpu.memory_space<vmem>>, vector<1x1x128xf32>,
      %cst_31 = arith.constant 0.000000e+00 : f32
      %46 = vector.broadcast %cst_31 : f32 to vector<1x128xf32>
      %c0_32 = arith.constant 0 : index
      %c0_33 = arith.constant 0 : index
      %c0_34 = arith.constant 0 : index
      %47 = vector.load %arg6[%c0_32, %c0_33, %c0_34] : memref<1x1x128xf32, #tpu.memory_space<vmem>>, vector<1x1x128xf32>
      %48 = vector.shape_cast %47 : vector<1x1x128xf32> to vector<1x128xf32>
      %49 = vector.shape_cast %46 : vector<1x128xf32> to vector<1x1x128xf32>
      tpu.vector_store %arg6[%c0_32, %c0_33, %c0_34], %49 {strides = array<i32>} : memref<1x1x128xf32, #tpu.memory_space<vmem>>, vector<1x1x128xf32>,
      %cst_35 = arith.constant 0.000000e+00 : f32
      %50 = vector.broadcast %cst_35 : f32 to vector<1x128xf32>
      %c0_36 = arith.constant 0 : index
      %c0_37 = arith.constant 0 : index
      %c0_38 = arith.constant 0 : index
      %51 = vector.load %arg7[%c0_36, %c0_37, %c0_38] : memref<1x1x128xf32, #tpu.memory_space<vmem>>, vector<1x1x128xf32>
      %52 = vector.shape_cast %51 : vector<1x1x128xf32> to vector<1x128xf32>
      %53 = vector.shape_cast %50 : vector<1x128xf32> to vector<1x1x128xf32>
      tpu.vector_store %arg7[%c0_36, %c0_37, %c0_38], %53 {strides = array<i32>} : memref<1x1x128xf32, #tpu.memory_space<vmem>>, vector<1x1x128xf32>,
    } else {
    }
    %c0 = arith.constant 0 : index
    %3 = memref.load %arg2[%c0] : memref<1xf32, #tpu.memory_space<smem>>
    %c0_1 = arith.constant 0 : index
    %c0_2 = arith.constant 0 : index
    %4 = vector.load %arg3[%c0_1, %c0_2] : memref<1x128xf32, #tpu.memory_space<vmem>>, vector<1x128xf32>
    %c0_3 = arith.constant 0 : index
    %c0_4 = arith.constant 0 : index
    %5 = vector.load %arg4[%c0_3, %c0_4] : memref<1x128xf32, #tpu.memory_space<vmem>>, vector<1x128xf32>
    %cst = arith.constant 9.99999993E-9 : f32
    %6 = vector.broadcast %cst : f32 to vector<1x128xf32>
    %7 = arith.addf %4, %6 : vector<1x128xf32>
    %8 = math.log %7 : vector<1x128xf32>
    %cst_5 = arith.constant 9.99999993E-9 : f32
    %9 = vector.broadcast %cst_5 : f32 to vector<1x128xf32>
    %10 = arith.addf %5, %9 : vector<1x128xf32>
    %11 = math.log %10 : vector<1x128xf32>
    %12 = arith.subf %8, %11 : vector<1x128xf32>
    %13 = vector.broadcast %3 : f32 to vector<1x128xf32>
    %14 = arith.subf %12, %13 : vector<1x128xf32>
    %15 = arith.subf %4, %5 : vector<1x128xf32>
    %c0_6 = arith.constant 0 : index
    %c0_7 = arith.constant 0 : index
    %c0_8 = arith.constant 0 : index
    %16 = vector.load %arg5[%c0_6, %c0_7, %c0_8] : memref<1x1x128xf32, #tpu.memory_space<vmem>>, vector<1x1x128xf32>
    %17 = vector.shape_cast %16 : vector<1x1x128xf32> to vector<1x128xf32>
    %cst_9 = arith.constant dense<0.000000e+00> : vector<128xf32>
    %18 = vector.multi_reduction <add>, %14, %cst_9 [0] : vector<1x128xf32> to vector<128xf32>
    %19 = vector.shape_cast %18 : vector<128xf32> to vector<1x128xf32>
    %20 = arith.addf %17, %19 : vector<1x128xf32>
    %c0_10 = arith.constant 0 : index
    %c0_11 = arith.constant 0 : index
    %c0_12 = arith.constant 0 : index
    %21 = vector.load %arg5[%c0_10, %c0_11, %c0_12] : memref<1x1x128xf32, #tpu.memory_space<vmem>>, vector<1x1x128xf32>
    %22 = vector.shape_cast %21 : vector<1x1x128xf32> to vector<1x128xf32>
    %23 = vector.shape_cast %20 : vector<1x128xf32> to vector<1x1x128xf32>
    tpu.vector_store %arg5[%c0_10, %c0_11, %c0_12], %23 {strides = array<i32>} : memref<1x1x128xf32, #tpu.memory_space<vmem>>, vector<1x1x128xf32>,
    %c0_13 = arith.constant 0 : index
    %c0_14 = arith.constant 0 : index
    %c0_15 = arith.constant 0 : index
    %24 = vector.load %arg6[%c0_13, %c0_14, %c0_15] : memref<1x1x128xf32, #tpu.memory_space<vmem>>, vector<1x1x128xf32>
    %25 = vector.shape_cast %24 : vector<1x1x128xf32> to vector<1x128xf32>
    %26 = arith.mulf %14, %14 : vector<1x128xf32>
    %cst_16 = arith.constant dense<0.000000e+00> : vector<128xf32>
    %27 = vector.multi_reduction <add>, %26, %cst_16 [0] : vector<1x128xf32> to vector<128xf32>
    %28 = vector.shape_cast %27 : vector<128xf32> to vector<1x128xf32>
    %29 = arith.addf %25, %28 : vector<1x128xf32>
    %c0_17 = arith.constant 0 : index
    %c0_18 = arith.constant 0 : index
    %c0_19 = arith.constant 0 : index
    %30 = vector.load %arg6[%c0_17, %c0_18, %c0_19] : memref<1x1x128xf32, #tpu.memory_space<vmem>>, vector<1x1x128xf32>
    %31 = vector.shape_cast %30 : vector<1x1x128xf32> to vector<1x128xf32>
    %32 = vector.shape_cast %29 : vector<1x128xf32> to vector<1x1x128xf32>
    tpu.vector_store %arg6[%c0_17, %c0_18, %c0_19], %32 {strides = array<i32>} : memref<1x1x128xf32, #tpu.memory_space<vmem>>, vector<1x1x128xf32>,
    %c0_20 = arith.constant 0 : index
    %c0_21 = arith.constant 0 : index
    %c0_22 = arith.constant 0 : index
    %33 = vector.load %arg7[%c0_20, %c0_21, %c0_22] : memref<1x1x128xf32, #tpu.memory_space<vmem>>, vector<1x1x128xf32>
    %34 = vector.shape_cast %33 : vector<1x1x128xf32> to vector<1x128xf32>
    %35 = arith.mulf %15, %15 : vector<1x128xf32>
    %cst_23 = arith.constant dense<0.000000e+00> : vector<128xf32>
    %36 = vector.multi_reduction <add>, %35, %cst_23 [0] : vector<1x128xf32> to vector<128xf32>
    %37 = vector.shape_cast %36 : vector<128xf32> to vector<1x128xf32>
    %38 = arith.addf %34, %37 : vector<1x128xf32>
    %c0_24 = arith.constant 0 : index
    %c0_25 = arith.constant 0 : index
    %c0_26 = arith.constant 0 : index
    %39 = vector.load %arg7[%c0_24, %c0_25, %c0_26] : memref<1x1x128xf32, #tpu.memory_space<vmem>>, vector<1x1x128xf32>
    %40 = vector.shape_cast %39 : vector<1x1x128xf32> to vector<1x128xf32>
    %41 = vector.shape_cast %38 : vector<1x128xf32> to vector<1x1x128xf32>
    tpu.vector_store %arg7[%c0_24, %c0_25, %c0_26], %41 {strides = array<i32>} : memref<1x1x128xf32, #tpu.memory_space<vmem>>, vector<1x1x128xf32>,
    return
  }
  func.func @transform_0(%arg0: i32, %arg1: i32) -> i32 {
    %c0_i32 = arith.constant 0 : i32
    %c0_i32_0 = arith.constant 0 : i32
    return %c0_i32 : i32
  }
  func.func @transform_1(%arg0: i32, %arg1: i32) -> (i32, i32) {
    %c1_i32 = arith.constant 1 : i32
    %0 = arith.muli %arg0, %c1_i32 : i32
    %1 = arith.addi %0, %arg1 : i32
    %c0_i32 = arith.constant 0 : i32
    %c0_i32_0 = arith.constant 0 : i32
    return %1, %c0_i32 : i32, i32
  }
  func.func @transform_2(%arg0: i32, %arg1: i32) -> (i32, i32) {
    %c1_i32 = arith.constant 1 : i32
    %0 = arith.muli %arg0, %c1_i32 : i32
    %1 = arith.addi %0, %arg1 : i32
    %c0_i32 = arith.constant 0 : i32
    %c0_i32_0 = arith.constant 0 : i32
    return %1, %c0_i32 : i32, i32
  }
  func.func @transform_3(%arg0: i32, %arg1: i32) -> (i32, i32, i32) {
    %c0_i32 = arith.constant 0 : i32
    %c0_i32_0 = arith.constant 0 : i32
    %c0_i32_1 = arith.constant 0 : i32
    return %arg0, %c0_i32, %c0_i32_0 : i32, i32, i32
  }
  func.func @transform_4(%arg0: i32, %arg1: i32) -> (i32, i32, i32) {
    %c0_i32 = arith.constant 0 : i32
    %c0_i32_0 = arith.constant 0 : i32
    %c0_i32_1 = arith.constant 0 : i32
    return %arg0, %c0_i32, %c0_i32_0 : i32, i32, i32
  }
  func.func @transform_5(%arg0: i32, %arg1: i32) -> (i32, i32, i32) {
    %c0_i32 = arith.constant 0 : i32
    %c0_i32_0 = arith.constant 0 : i32
    %c0_i32_1 = arith.constant 0 : i32
    return %arg0, %c0_i32, %c0_i32_0 : i32, i32, i32
  }
}

</mosaic_0001>

<bundles_post_ra>
// kernel: match_loss.1
= control target key start
LH: loop header
LB: loop body
LE: loop exit
PB: predicated region body
PF: predicated region fallthrough
CT: control target
= control target key end

     0   :  { %v103_v0 = vmov 0.0   ;;  %s170_s3 = inlined_call_operand.vmem [shape: f32[1,1,128], index: 3, kind: output, shape index: {0}]   ;;  %s171_s4 = inlined_call_operand.vmem [shape: f32[1,1,128], index: 4, kind: output, shape index: {1}]   ;;  %s172_s5 = inlined_call_operand.vmem [shape: f32[1,1,128], index: 5, kind: output, shape index: {2}]   ;;  %s173_s1 = inlined_call_operand.vmem [shape: f32[1,128], index: 1, kind: input, shape index: {}]   ;;  %s174_s2 = inlined_call_operand.vmem [shape: f32[1,128], index: 2, kind: input, shape index: {}]   ;;  %s175_s0 = inlined_call_operand.<no memory space> [shape: f32[1], index: 0, kind: input, shape index: {}]  }
   0x1   :  { %50 = vst [vmem:[%s170_s3] sm:$0x1] %v103_v0  ;;  %51 = vst [vmem:[%s171_s4] sm:$0x1] %v103_v0  ;;  %v54_v1 = vld [vmem:[%s173_s1] sm:$0x1]  ;;  %v63_v13 = vstv %s175_s0 }
   0x2   :  { %52 = vst [vmem:[%s172_s5] sm:$0x1] %v103_v0  ;;  %v55_v2 = vld [vmem:[%s174_s2] sm:$0x1]  ;;  %v56_v3 = vadd.f32 1e-08, %v54_v1 }
   0x3   :  { %v59_v4 = vadd.f32 1e-08, %v55_v2  ;;  %v65_v5 = vsub.f32 %v54_v1, %v55_v2 }
   0x4   :  { %99 = vlog2.f32 %v56_v3 }
   0x5   :  { %101 = vlog2.f32 %v59_v4  ;;  %v76_v6 = vmul.f32 %v65_v5, %v65_v5 }
   0x8   :  { %v66_v15 = vld [vmem:[%s170_s3] sm:$0x1] }
   0x9   :  { %v75_v7 = vld [vmem:[%s172_s5] sm:$0x1] }
   0xa   :  { %v78_v8 = vadd.f32 %v76_v6, %v75_v7  ;;  %v70_v17 = vld [vmem:[%s171_s4] sm:$0x1] }
   0xc   :  { %79 = vst [vmem:[%s172_s5] sm:$0x1] %v78_v8 }
   0xe   :  { %v100_v9 = vpop.eup %99 }
   0xf   :  { %v102_v10 = vpop.eup %101  ;;  %v58_v11 = vmul.f32 0.6931472, %v100_v9 }
  0x10   :  { %v61_v12 = vmul.f32 0.6931472, %v102_v10 }
  0x12   :  { %v62_v14 = vsub.f32 %v58_v11, %v61_v12 }
  0x14   :  { %v64_v16 = vsub.f32 %v62_v14, %v63_v13 }
  0x16   :  { %v68_v18 = vadd.f32 %v66_v15, %v64_v16  ;;  %v71_v19 = vmul.f32 %v64_v16, %v64_v16 }
  0x18   :  { %69 = vst [vmem:[%s170_s3] sm:$0x1] %v68_v18  ;;  %v73_v20 = vadd.f32 %v71_v19, %v70_v17 }
  0x1a   :  { %74 = vst [vmem:[%s171_s4] sm:$0x1] %v73_v20 }

</bundles_post_ra>
